<compile_context>
chip_gen: v5e
topology: v5e:2x2
jax: 0.10.0
libtpu: 0.0.40
codegen_flags: <defaults>
</compile_context>

<pallas_src>
import functools

import jax
import jax.numpy as jnp
from jax import lax
from jax.experimental import pallas as pl
from jax.experimental.pallas import tpu as pltpu

IGNORE_INDEX = 255
LANES = 128
MAX_SUBLANES = 256                       # 256 * 128 = 32768 pixels per grid step
VMEM_BUDGET = 24 * 1024 * 1024           # stay under the 32 MiB scoped default


def _choose_sublanes(num_classes, logit_bytes, n_rows):
    """Largest multiple-of-8 sublane count whose working set fits the budget."""
    per_row = (2 * num_classes * LANES * logit_bytes   # double-buffered logits tile
               + 2 * LANES * 4                          # double-buffered labels tile
               + 2 * 3 * LANES * 4                      # three resident f32 accumulators
               + 4 * num_classes * LANES * 4            # in-kernel (C, S, 128) f32 temps
               + 8 * LANES * 4)                         # per-pixel (S, 128) f32 temps
    s = int(VMEM_BUDGET // per_row)
    s = max(8, min(MAX_SUBLANES, (s // 8) * 8))
    s = min(s, (n_rows // 8) * 8)        # never a block taller than the row dim
    return max(8, s)


def _ce_dice_kernel(logits_ref, labels_ref, inter_ref, count_ref, logp_ref,
                    *, n_rows, n_tiles):
    """Accumulates softmax[true], valid-count and log_softmax[true] partials.

    logits_ref: (C, S, 128)      labels_ref: (S, 128) int32
    inter/count/logp refs: (S, 128) f32, resident across the inner grid axis.
    """
    o = pl.program_id(1)              # outer (parallel) pixel-chunk axis
    i = pl.program_id(2)              # inner reduction axis
    n_inner = pl.num_programs(2)
    s = logits_ref.shape[1]           # sublanes per tile (trace-time int)
    t = o * n_inner + i               # global row-tile index

    @pl.when(i == 0)
    def _():
        inter_ref[...] = jnp.zeros_like(inter_ref)
        count_ref[...] = jnp.zeros_like(count_ref)
        logp_ref[...] = jnp.zeros_like(logp_ref)

    def accumulate(mask_rows):
        labels = labels_ref[...].astype(jnp.int32)            # (S, 128)
        x = logits_ref[...].astype(jnp.float32)               # (C, S, 128)
        valid = labels != IGNORE_INDEX
        if mask_rows:
            # Cold path (last ragged tile only): rows past the array hold
            # garbage from the clipped DMA — mask them and zero the logits so
            # NaN/Inf can never reach exp/log.
            row = lax.broadcasted_iota(jnp.int32, labels.shape, 0)
            in_bounds = (t * s + row) < n_rows
            valid = jnp.logical_and(valid, in_bounds)
            x = jnp.where(in_bounds[None], x, 0.0)
        validf = valid.astype(jnp.float32)

        # Class axis is a leading (vreg-batch) dim: these reduce element-wise
        # on the VALU, no cross-sublane XLU work.
        m = jnp.max(x, axis=0)                                 # (S, 128)
        z = x - m[None]
        sden = jnp.sum(jnp.exp(z), axis=0)                     # (S, 128)
        cls = lax.broadcasted_iota(jnp.int32, z.shape, 0)      # (C, S, 128)
        z_true = jnp.sum(jnp.where(cls == labels[None], z, 0.0), axis=0)

        lp = z_true - jnp.log(sden)                            # log_softmax[true]
        count_ref[...] += validf
        logp_ref[...] += lp * validf
        inter_ref[...] += jnp.exp(lp) * validf                 # softmax[true]

    if n_rows % s != 0:
        is_last = t == (n_tiles - 1)

        @pl.when(is_last)
        def _():
            accumulate(True)

        @pl.when(jnp.logical_not(is_last))
        def _():
            accumulate(False)
    else:
        accumulate(False)


@functools.partial(jax.jit, static_argnames=("ce_weight", "dice_weight",
                                             "smooth", "eps"))
def ce_dice_loss(output, target, ce_weight=0.5, dice_weight=0.5,
                 smooth=0.0, eps=1e-10):
    """CE_DiceLoss forward: ce_weight * CrossEntropy + dice_weight * Dice."""
    N, C, H, W = output.shape
    HW = H * W

    logits = output.reshape(N, C, HW)                  # free reshape, NCHW kept
    if target.dtype != jnp.int32:
        target = target.astype(jnp.int32)              # no-op for int32 labels
    labels = target.reshape(N, HW)

    # Pad the pixel axis to a multiple of 128 lanes (and at least 8 rows) so a
    # free (N, C, R, 128) view exists.  Padded pixels carry IGNORE_INDEX and
    # contribute nothing.  Typical segmentation shapes (HW % 128 == 0, HW big)
    # hit pad == 0 and pay no copy.
    pad = (-HW) % LANES
    n_rows = (HW + pad) // LANES
    if n_rows < 8:
        pad += (8 - n_rows) * LANES
        n_rows = 8
    if pad:
        logits = jnp.pad(logits, ((0, 0), (0, 0), (0, pad)))
        labels = jnp.pad(labels, ((0, 0), (0, pad)),
                         constant_values=IGNORE_INDEX)
    logits = logits.reshape(N, C, n_rows, LANES)
    labels = labels.reshape(N, n_rows, LANES)

    S = _choose_sublanes(C, logits.dtype.itemsize, n_rows)
    n_tiles = -(-n_rows // S)

    # v7x has 2 TensorCores: give them a parallel axis even when N == 1 by
    # splitting the pixel tiles into an outer parallel chunk axis.
    if N == 1 and n_tiles % 2 == 0:
        n_outer, n_inner = 2, n_tiles // 2
    else:
        n_outer, n_inner = 1, n_tiles

    acc_shape = jax.ShapeDtypeStruct((N, n_outer, S, LANES), jnp.float32)
    acc_spec = pl.BlockSpec((None, None, S, LANES), lambda n, o, i: (n, o, 0, 0))

    cost = pl.CostEstimate(
        flops=10 * N * C * n_rows * LANES,
        transcendentals=(C + 2) * N * n_rows * LANES,
        bytes_accessed=(logits.size * logits.dtype.itemsize
                        + labels.size * 4
                        + 3 * N * n_outer * S * LANES * 4),
    )

    inter_p, count_p, logp_p = pl.pallas_call(
        functools.partial(_ce_dice_kernel, n_rows=n_rows, n_tiles=n_tiles),
        out_shape=(acc_shape, acc_shape, acc_shape),
        grid_spec=pltpu.PrefetchScalarGridSpec(
            num_scalar_prefetch=0,
            grid=(N, n_outer, n_inner),
            in_specs=[
                pl.BlockSpec((None, C, S, LANES),
                             lambda n, o, i: (n, 0, o * n_inner + i, 0)),
                pl.BlockSpec((None, S, LANES),
                             lambda n, o, i: (n, o * n_inner + i, 0)),
            ],
            out_specs=[acc_spec, acc_spec, acc_spec],
        ),
        compiler_params=pltpu.CompilerParams(
            dimension_semantics=("parallel", "parallel", "arbitrary")),
        cost_estimate=cost,
    )(logits, labels)

    # Tiny final reductions of the lane/sublane-parallel partials (JAX glue).
    inter = jnp.sum(inter_p)
    count = jnp.sum(count_p)   # valid-pixel count == one-hot sum == preds sum
    logp = jnp.sum(logp_p)

    # nn.CrossEntropyLoss(ignore_index): mean -log p[true] over valid pixels.
    # (count == 0 -> NaN, matching PyTorch.)
    ce_loss = -logp / count
    # Dice: preds.sum() == count (softmax sums to 1 per valid pixel), so the
    # denominator preds.sum() + one_hot.sum() is 2 * count.
    dice_loss = 1.0 - (2.0 * inter + smooth) / (2.0 * count + smooth + eps)
    return ce_weight * ce_loss + dice_weight * dice_loss


def _reference(output, target, ce_weight=0.5, dice_weight=0.5, eps=1e-10):
    """Pure-JAX reference mirroring the PyTorch module."""
    N, C, H, W = output.shape
    logits = jnp.transpose(output, (0, 2, 3, 1)).reshape(-1, C)
    labels = target.reshape(-1)
    valid = labels != IGNORE_INDEX
    validf = valid.astype(jnp.float32)
    safe_labels = jnp.where(valid, labels, 0)
    logz = jax.nn.log_softmax(logits, axis=-1)
    probs = jax.nn.softmax(logits, axis=-1)
    onehot = jax.nn.one_hot(safe_labels, C) * validf[:, None]
    ce = -jnp.sum(jnp.take_along_axis(logz, safe_labels[:, None], axis=1)[:, 0]
                  * validf) / jnp.sum(validf)
    inter = jnp.sum(probs * onehot)
    psum = jnp.sum(probs * validf[:, None])
    lsum = jnp.sum(onehot)
    dice = 1.0 - 2.0 * inter / (psum + lsum + eps)
    return ce_weight * ce + dice_weight * dice


if __name__ == "__main__":
    cases = [
        (2, 4, 16, 16),   # multi-batch, HW % 128 == 0 (padded only up to 8 rows)
        (1, 5, 15, 15),   # ragged HW=225: exercises the wrapper pad path
        (1, 3, 32, 40),   # HW=1280 -> 10 rows: ragged last tile (cold-path row
                          # mask) + N==1 megacore split (outer parallel chunks)
    ]
    case_keys = jax.random.split(jax.random.PRNGKey(0), len(cases))
    for (N, C, H, W), ck in zip(cases, case_keys):
        k1, k2, k3 = jax.random.split(ck, 3)
        logits = jax.random.normal(k1, (N, C, H, W), dtype=jnp.float32)
        labels = jax.random.randint(k2, (N, H, W), 0, C, dtype=jnp.int32)
        ignore_mask = jax.random.uniform(k3, (N, H, W)) < 0.1
        labels = jnp.where(ignore_mask, IGNORE_INDEX, labels)

        loss = jax.block_until_ready(ce_dice_loss(logits, labels))
        ref = _reference(logits, labels)
        assert jnp.allclose(loss, ref, rtol=1e-5, atol=1e-5), (N, C, H, W, loss, ref)

    print("KERNEL_OK")
</pallas_src>

<mosaic_0001>
module attributes {stable_mosaic.version = 11 : i64} {
  func.func @_ce_dice_kernel(%arg0: i32, %arg1: i32, %arg2: i32, %arg3: memref<1x4x8x128xf32, #tpu.memory_space<vmem>>, %arg4: memref<1x8x128xi32, #tpu.memory_space<vmem>>, %arg5: memref<1x1x8x128xf32, #tpu.memory_space<vmem>>, %arg6: memref<1x1x8x128xf32, #tpu.memory_space<vmem>>, %arg7: memref<1x1x8x128xf32, #tpu.memory_space<vmem>>) attributes {dimension_semantics = [#tpu.dimension_semantics<parallel>, #tpu.dimension_semantics<parallel>, #tpu.dimension_semantics<arbitrary>], iteration_bounds = array<i64: 2, 1, 1>, scalar_prefetch = 0 : i64, scratch_operands = 0 : i64, tpu.core_type = #tpu.core_type<tc>, window_params = [{transform_indices = @transform_0, window_bounds = array<i64: 1, 4, 8, 128>}, {transform_indices = @transform_1, window_bounds = array<i64: 1, 8, 128>}, {transform_indices = @transform_2, window_bounds = array<i64: 1, 1, 8, 128>}, {transform_indices = @transform_3, window_bounds = array<i64: 1, 1, 8, 128>}, {transform_indices = @transform_4, window_bounds = array<i64: 1, 1, 8, 128>}]} {
    %c0_i32 = arith.constant 0 : i32
    %0 = arith.cmpi eq, %arg2, %c0_i32 : i32
    %1 = arith.extui %0 : i1 to i32
    %c0_i32_0 = arith.constant 0 : i32
    %2 = arith.cmpi ne, %1, %c0_i32_0 : i32
    scf.if %2 {
      %cst_34 = arith.constant 0.000000e+00 : f32
      %47 = vector.broadcast %cst_34 : f32 to vector<8x128xf32>
      %c0_35 = arith.constant 0 : index
      %c0_36 = arith.constant 0 : index
      %c0_37 = arith.constant 0 : index
      %c0_38 = arith.constant 0 : index
      %48 = vector.load %arg5[%c0_35, %c0_36, %c0_37, %c0_38] : memref<1x1x8x128xf32, #tpu.memory_space<vmem>>, vector<1x1x8x128xf32>
      %49 = vector.shape_cast %48 : vector<1x1x8x128xf32> to vector<8x128xf32>
      %50 = vector.shape_cast %47 : vector<8x128xf32> to vector<1x1x8x128xf32>
      tpu.vector_store %arg5[%c0_35, %c0_36, %c0_37, %c0_38], %50 {strides = array<i32>} : memref<1x1x8x128xf32, #tpu.memory_space<vmem>>, vector<1x1x8x128xf32>,
      %cst_39 = arith.constant 0.000000e+00 : f32
      %51 = vector.broadcast %cst_39 : f32 to vector<8x128xf32>
      %c0_40 = arith.constant 0 : index
      %c0_41 = arith.constant 0 : index
      %c0_42 = arith.constant 0 : index
      %c0_43 = arith.constant 0 : index
      %52 = vector.load %arg6[%c0_40, %c0_41, %c0_42, %c0_43] : memref<1x1x8x128xf32, #tpu.memory_space<vmem>>, vector<1x1x8x128xf32>
      %53 = vector.shape_cast %52 : vector<1x1x8x128xf32> to vector<8x128xf32>
      %54 = vector.shape_cast %51 : vector<8x128xf32> to vector<1x1x8x128xf32>
      tpu.vector_store %arg6[%c0_40, %c0_41, %c0_42, %c0_43], %54 {strides = array<i32>} : memref<1x1x8x128xf32, #tpu.memory_space<vmem>>, vector<1x1x8x128xf32>,
      %cst_44 = arith.constant 0.000000e+00 : f32
      %55 = vector.broadcast %cst_44 : f32 to vector<8x128xf32>
      %c0_45 = arith.constant 0 : index
      %c0_46 = arith.constant 0 : index
      %c0_47 = arith.constant 0 : index
      %c0_48 = arith.constant 0 : index
      %56 = vector.load %arg7[%c0_45, %c0_46, %c0_47, %c0_48] : memref<1x1x8x128xf32, #tpu.memory_space<vmem>>, vector<1x1x8x128xf32>
      %57 = vector.shape_cast %56 : vector<1x1x8x128xf32> to vector<8x128xf32>
      %58 = vector.shape_cast %55 : vector<8x128xf32> to vector<1x1x8x128xf32>
      tpu.vector_store %arg7[%c0_45, %c0_46, %c0_47, %c0_48], %58 {strides = array<i32>} : memref<1x1x8x128xf32, #tpu.memory_space<vmem>>, vector<1x1x8x128xf32>,
    } else {
    }
    %c0 = arith.constant 0 : index
    %c0_1 = arith.constant 0 : index
    %c0_2 = arith.constant 0 : index
    %3 = vector.load %arg4[%c0, %c0_1, %c0_2] : memref<1x8x128xi32, #tpu.memory_space<vmem>>, vector<1x8x128xi32>
    %4 = vector.shape_cast %3 : vector<1x8x128xi32> to vector<8x128xi32>
    %c0_3 = arith.constant 0 : index
    %c0_4 = arith.constant 0 : index
    %c0_5 = arith.constant 0 : index
    %c0_6 = arith.constant 0 : index
    %5 = vector.load %arg3[%c0_3, %c0_4, %c0_5, %c0_6] : memref<1x4x8x128xf32, #tpu.memory_space<vmem>>, vector<1x4x8x128xf32>
    %6 = vector.shape_cast %5 : vector<1x4x8x128xf32> to vector<4x8x128xf32>
    %c255_i32 = arith.constant 255 : i32
    %7 = vector.broadcast %c255_i32 : i32 to vector<8x128xi32>
    %8 = arith.cmpi ne, %4, %7 : vector<8x128xi32>
    %9 = arith.extui %8 : vector<8x128xi1> to vector<8x128xi32>
    %10 = arith.sitofp %9 : vector<8x128xi32> to vector<8x128xf32>
    %cst = arith.constant dense<0xFF800000> : vector<8x128xf32>
    %11 = vector.multi_reduction <maximumf>, %6, %cst [0] : vector<4x8x128xf32> to vector<8x128xf32>
    %12 = vector.shape_cast %11 : vector<8x128xf32> to vector<1x8x128xf32>
    %13 = vector.broadcast %12 : vector<1x8x128xf32> to vector<4x8x128xf32>
    %14 = arith.subf %6, %13 : vector<4x8x128xf32>
    %15 = math.exp %14 : vector<4x8x128xf32>
    %cst_7 = arith.constant dense<0.000000e+00> : vector<8x128xf32>
    %16 = vector.multi_reduction <add>, %15, %cst_7 [0] : vector<4x8x128xf32> to vector<8x128xf32>
    %17 = tpu.iota {dimensions = array<i32: 0>} : vector<4x8x128xi32>
    %18 = vector.shape_cast %4 : vector<8x128xi32> to vector<1x8x128xi32>
    %19 = vector.broadcast %18 : vector<1x8x128xi32> to vector<4x8x128xi32>
    %20 = arith.cmpi eq, %17, %19 : vector<4x8x128xi32>
    %cst_8 = arith.constant 0.000000e+00 : f32
    %21 = vector.broadcast %cst_8 : f32 to vector<4x8x128xf32>
    %22 = arith.select %20, %14, %21 : vector<4x8x128xi1>, vector<4x8x128xf32>
    %cst_9 = arith.constant dense<0.000000e+00> : vector<8x128xf32>
    %23 = vector.multi_reduction <add>, %22, %cst_9 [0] : vector<4x8x128xf32> to vector<8x128xf32>
    %24 = math.log %16 : vector<8x128xf32>
    %25 = arith.subf %23, %24 : vector<8x128xf32>
    %c0_10 = arith.constant 0 : index
    %c0_11 = arith.constant 0 : index
    %c0_12 = arith.constant 0 : index
    %c0_13 = arith.constant 0 : index
    %26 = vector.load %arg6[%c0_10, %c0_11, %c0_12, %c0_13] : memref<1x1x8x128xf32, #tpu.memory_space<vmem>>, vector<1x1x8x128xf32>
    %27 = vector.shape_cast %26 : vector<1x1x8x128xf32> to vector<8x128xf32>
    %28 = arith.addf %27, %10 : vector<8x128xf32>
    %c0_14 = arith.constant 0 : index
    %c0_15 = arith.constant 0 : index
    %c0_16 = arith.constant 0 : index
    %c0_17 = arith.constant 0 : index
    %29 = vector.load %arg6[%c0_14, %c0_15, %c0_16, %c0_17] : memref<1x1x8x128xf32, #tpu.memory_space<vmem>>, vector<1x1x8x128xf32>
    %30 = vector.shape_cast %29 : vector<1x1x8x128xf32> to vector<8x128xf32>
    %31 = vector.shape_cast %28 : vector<8x128xf32> to vector<1x1x8x128xf32>
    tpu.vector_store %arg6[%c0_14, %c0_15, %c0_16, %c0_17], %31 {strides = array<i32>} : memref<1x1x8x128xf32, #tpu.memory_space<vmem>>, vector<1x1x8x128xf32>,
    %c0_18 = arith.constant 0 : index
    %c0_19 = arith.constant 0 : index
    %c0_20 = arith.constant 0 : index
    %c0_21 = arith.constant 0 : index
    %32 = vector.load %arg7[%c0_18, %c0_19, %c0_20, %c0_21] : memref<1x1x8x128xf32, #tpu.memory_space<vmem>>, vector<1x1x8x128xf32>
    %33 = vector.shape_cast %32 : vector<1x1x8x128xf32> to vector<8x128xf32>
    %34 = arith.mulf %25, %10 : vector<8x128xf32>
    %35 = arith.addf %33, %34 : vector<8x128xf32>
    %c0_22 = arith.constant 0 : index
    %c0_23 = arith.constant 0 : index
    %c0_24 = arith.constant 0 : index
    %c0_25 = arith.constant 0 : index
    %36 = vector.load %arg7[%c0_22, %c0_23, %c0_24, %c0_25] : memref<1x1x8x128xf32, #tpu.memory_space<vmem>>, vector<1x1x8x128xf32>
    %37 = vector.shape_cast %36 : vector<1x1x8x128xf32> to vector<8x128xf32>
    %38 = vector.shape_cast %35 : vector<8x128xf32> to vector<1x1x8x128xf32>
    tpu.vector_store %arg7[%c0_22, %c0_23, %c0_24, %c0_25], %38 {strides = array<i32>} : memref<1x1x8x128xf32, #tpu.memory_space<vmem>>, vector<1x1x8x128xf32>,
    %c0_26 = arith.constant 0 : index
    %c0_27 = arith.constant 0 : index
    %c0_28 = arith.constant 0 : index
    %c0_29 = arith.constant 0 : index
    %39 = vector.load %arg5[%c0_26, %c0_27, %c0_28, %c0_29] : memref<1x1x8x128xf32, #tpu.memory_space<vmem>>, vector<1x1x8x128xf32>
    %40 = vector.shape_cast %39 : vector<1x1x8x128xf32> to vector<8x128xf32>
    %41 = math.exp %25 : vector<8x128xf32>
    %42 = arith.mulf %41, %10 : vector<8x128xf32>
    %43 = arith.addf %40, %42 : vector<8x128xf32>
    %c0_30 = arith.constant 0 : index
    %c0_31 = arith.constant 0 : index
    %c0_32 = arith.constant 0 : index
    %c0_33 = arith.constant 0 : index
    %44 = vector.load %arg5[%c0_30, %c0_31, %c0_32, %c0_33] : memref<1x1x8x128xf32, #tpu.memory_space<vmem>>, vector<1x1x8x128xf32>
    %45 = vector.shape_cast %44 : vector<1x1x8x128xf32> to vector<8x128xf32>
    %46 = vector.shape_cast %43 : vector<8x128xf32> to vector<1x1x8x128xf32>
    tpu.vector_store %arg5[%c0_30, %c0_31, %c0_32, %c0_33], %46 {strides = array<i32>} : memref<1x1x8x128xf32, #tpu.memory_space<vmem>>, vector<1x1x8x128xf32>,
    return
  }
  func.func @transform_0(%arg0: i32, %arg1: i32, %arg2: i32) -> (i32, i32, i32, i32) {
    %c1_i32 = arith.constant 1 : i32
    %0 = arith.muli %arg1, %c1_i32 : i32
    %1 = arith.addi %0, %arg2 : i32
    %c0_i32 = arith.constant 0 : i32
    %c0_i32_0 = arith.constant 0 : i32
    %c0_i32_1 = arith.constant 0 : i32
    return %arg0, %c0_i32, %1, %c0_i32_0 : i32, i32, i32, i32
  }
  func.func @transform_1(%arg0: i32, %arg1: i32, %arg2: i32) -> (i32, i32, i32) {
    %c1_i32 = arith.constant 1 : i32
    %0 = arith.muli %arg1, %c1_i32 : i32
    %1 = arith.addi %0, %arg2 : i32
    %c0_i32 = arith.constant 0 : i32
    %c0_i32_0 = arith.constant 0 : i32
    return %arg0, %1, %c0_i32 : i32, i32, i32
  }
  func.func @transform_2(%arg0: i32, %arg1: i32, %arg2: i32) -> (i32, i32, i32, i32) {
    %c0_i32 = arith.constant 0 : i32
    %c0_i32_0 = arith.constant 0 : i32
    %c0_i32_1 = arith.constant 0 : i32
    return %arg0, %arg1, %c0_i32, %c0_i32_0 : i32, i32, i32, i32
  }
  func.func @transform_3(%arg0: i32, %arg1: i32, %arg2: i32) -> (i32, i32, i32, i32) {
    %c0_i32 = arith.constant 0 : i32
    %c0_i32_0 = arith.constant 0 : i32
    %c0_i32_1 = arith.constant 0 : i32
    return %arg0, %arg1, %c0_i32, %c0_i32_0 : i32, i32, i32, i32
  }
  func.func @transform_4(%arg0: i32, %arg1: i32, %arg2: i32) -> (i32, i32, i32, i32) {
    %c0_i32 = arith.constant 0 : i32
    %c0_i32_0 = arith.constant 0 : i32
    %c0_i32_1 = arith.constant 0 : i32
    return %arg0, %arg1, %c0_i32, %c0_i32_0 : i32, i32, i32, i32
  }
}

</mosaic_0001>

<bundles_post_ra>
// kernel: ce_dice_loss.1
= control target key start
LH: loop header
LB: loop body
LE: loop exit
PB: predicated region body
PF: predicated region fallthrough
CT: control target
= control target key end

     0   :  { %s652_s15 = smov 0   ;;  %s654_s16 = smov 0   ;;  %s700_s0 = inlined_call_operand.vmem [shape: f32[2,4,8,128], index: 0, kind: input, shape index: {}]   ;;  %s701_s1 = inlined_call_operand.vmem [shape: s32[2,8,128], index: 1, kind: input, shape index: {}]   ;;  %s702_s2 = inlined_call_operand.vmem [shape: f32[2,1,8,128], index: 2, kind: output, shape index: {0}]   ;;  %s703_s3 = inlined_call_operand.vmem [shape: f32[2,1,8,128], index: 3, kind: output, shape index: {1}]   ;;  %s704_s4 = inlined_call_operand.vmem [shape: f32[2,1,8,128], index: 4, kind: output, shape index: {2}]  }
   0x1   :  { %s656_s17 = smov 0  }
   0x2 LB: > { %s34_s18 = sadd.s32 1, %s620_s16  ;;  %p554_p0 = scmp.ge.s32.totalorder %s624_s17, 1  ;;  %s624_s17 = sphi %s656_s17, %s15_s17   ;;  %s620_s16 = sphi %s654_s16, %s706_s16   ;;  %s616_s15 = sphi %s652_s15, %s705_s15  }
   0x3   : > { %p36_p1 = scmp.ge.s32.totalorder %s34_s18, 2  ;;  %p219_p2 = scmp.lt.s32.totalorder %s624_s17, 3 }
   0x5   : > { %s708_s18 = smov (%p36_p1, %s34_s18), 0  ;;  %p220_p3 = pnand %p554_p0, %p219_p2 }
   0x6   : > { %p274_p4 = scmp.lt.s32.totalorder (!%p220_p3), %s616_s15, 1 }
   0x7   : > { %223 = sbr.rel (%p220_p3) target bundleno = 62 (0x3e), region = 28 }
   0xc   : > { %s710_s15 = smov (!%p274_p4, %s616_s15), 1  ;;  %v626_v7 = vmov 0.0  }
   0xd   : > { %s564_s19 = sshll.u32 %s710_s15, 5  ;;  %s670_s20 = sshll.u32 %s710_s15, 3 }
   0xe   : > { %s281_s23 = scalar_lea.vmem %s700_s0, %s564_s19  ;;  %s290_s26 = scalar_lea.vmem %s701_s1, %s670_s20 }
   0xf   : > { %v320_v0 = vld [vmem:[%s290_s26] sm:$0xff]  ;;  %v322_v2 = vld [vmem:[%s281_s23 + $0x8] sm:$0xff]  ;;  %v323_v3 = vld [vmem:[%s281_s23 + $0x10] sm:$0xff]  ;;  %s305_s29 = scalar_lea.vmem %s703_s3, %s670_s20  ;;  %s312_s6 = scalar_lea.vmem %s704_s4, %s670_s20 }
  0x10   : > { %v321_v1 = vld [vmem:[%s281_s23] sm:$0xff]  ;;  %v324_v4 = vld [vmem:[%s281_s23 + $0x18] sm:$0xff]  ;;  %vm325_vm0 = vcmp.ne.s32.totalorder %v320_v0, 255  ;;  %vm346_vm1 = vcmp.eq.s32.totalorder %v320_v0, 0  ;;  %vm347_vm2 = vcmp.eq.s32.totalorder %v320_v0, 1  ;;  %vm348_vm3 = vcmp.eq.s32.totalorder %v320_v0, 2  ;;  %s298_s9 = scalar_lea.vmem %s702_s2, %s670_s20 }
  0x11   : > { %v328_v5 = vmax.f32 %v321_v1, %v322_v2  ;;  %v329_v6 = vmax.f32 %v323_v3, %v324_v4  ;;  %v561_v8 = vsel %vm325_vm0, 1.0, %v626_v7  ;;  %vm349_vm4 = vcmp.eq.s32.totalorder %v320_v0, 3 }
  0x12   : > { %362 = vst [vmem:[%s305_s29] sm:$0xff] %v561_v8 }
  0x13   : > { %v330_v9 = vmax.f32 %v328_v5, %v329_v6 }
  0x15   : > { %v331_v10 = vsub.f32 %v321_v1, %v330_v9  ;;  %v332_v11 = vsub.f32 %v322_v2, %v330_v9  ;;  %v333_v12 = vsub.f32 %v323_v3, %v330_v9  ;;  %v334_v13 = vsub.f32 %v324_v4, %v330_v9 }
  0x17   : > { %v335_v14 = vmul.f32 1.442695, %v331_v10  ;;  %v337_v15 = vmul.f32 1.442695, %v332_v11  ;;  %v339_v16 = vmul.f32 1.442695, %v333_v12 }
  0x18   : > { %v341_v17 = vmul.f32 1.442695, %v334_v13  ;;  %v350_v22 = vsel %vm346_vm1, %v331_v10, 0.0  ;;  %v351_v23 = vsel %vm347_vm2, %v332_v11, 0.0  ;;  %v352_v28 = vsel %vm348_vm3, %v333_v12, 0.0 }
  0x19   : > { %590 = vpow2.f32 %v335_v14  ;;  %v354_v26 = vadd.f32 %v351_v23, %v350_v22  ;;  %v353_v30 = vsel %vm349_vm4, %v334_v13, 0.0 }
  0x1a   : > { %592 = vpow2.f32 %v337_v15 }
  0x1b   : > { %594 = vpow2.f32 %v339_v16  ;;  %v355_v29 = vadd.f32 %v354_v26, %v352_v28 }
  0x1c   : > { %596 = vpow2.f32 %v341_v17 }
  0x1d   : > { %v356_v31 = vadd.f32 %v355_v29, %v353_v30 }
  0x1f   : > { %v591_v18 = vpop.eup %590 }
  0x20   : > { %v593_v19 = vpop.eup %592 }
  0x21   : > { %v595_v20 = vpop.eup %594  ;;  %v343_v21 = vadd.f32 %v593_v19, %v591_v18 }
  0x22   : > { %v597_v24 = vpop.eup %596 }
  0x23   : > { %v344_v25 = vadd.f32 %v595_v20, %v343_v21 }
  0x25   : > { %v345_v27 = vadd.f32 %v597_v24, %v344_v25 }
  0x27   : > { %598 = vlog2.f32 %v345_v27 }
  0x2d   : > { %v599_v32 = vpop.eup %598 }
  0x2e   : > { %v358_v33 = vmul.f32 0.6931472, %v599_v32 }
  0x30   : > { %v359_v34 = vsub.f32 %v356_v31, %v358_v33 }
  0x32   : > { %v364_v35 = vmul.f32 %v561_v8, %v359_v34  ;;  %v368_v36 = vmul.f32 1.442695, %v359_v34 }
  0x34   : > { %600 = vpow2.f32 %v368_v36  ;;  %366 = vst [vmem:[%s312_s6] sm:$0xff] %v364_v35 }
  0x3a   : > { %v601_v37 = vpop.eup %600 }
  0x3b   : > { %v370_v38 = vmul.f32 %v601_v37, %v561_v8 }
  0x3d   : > { %372 = vst [vmem:[%s298_s9] sm:$0xff] %v370_v38 }
  0x3e PF: > { %s15_s17 = sadd.s32 1, %s624_s17   ;;  %s705_s15 = smov %s620_s16 }
  0x3f   : > { %p12_p5 = scmp.ge.s32.totalorder %s15_s17, 4   ;;  %s706_s16 = smov %s708_s18 }
  0x41   :  { %14 = sbr.rel (!%p12_p5) target bundleno = 2 (0x2), region = 89 }

</bundles_post_ra>
